<compile_context>
chip_gen: v7x
topology: tpu7x:2x2x1
jax: 0.10.0
libtpu: 0.0.40
codegen_flags: <defaults>
</compile_context>

<pallas_src>
import functools
import math

import numpy as np
import jax
import jax.numpy as jnp
from jax.experimental import pallas as pl
from jax.experimental.pallas import tpu as pltpu

C_IN = 3                     # input image channels
FEAT_C = 512                 # `features` output channels (required by classifier)
POOL = 7                     # AdaptiveAvgPool2d((7, 7))
FLAT = FEAT_C * POOL * POOL  # 25088
HID = 4096
NUM_CLASSES = 1000
NUM_CLASSES_PAD = 1024       # lane-dense (multiple of 128) final layer
VMEM_LIMIT = 48 * 1024 * 1024  # fits v7x's 64 MiB physical VMEM with headroom;
                               # all chosen tiles stay well under it on v5e/v6e too.


# ---------------------------------------------------------------------------
# Kernel 1: features (1x1 conv + ReLU) + AdaptiveAvgPool2d((7,7)).
# One batch element per grid step. Output is (49, 512) per sample so the last
# (lane) dim is 512 -> unmasked, lane-dense stores.
# ---------------------------------------------------------------------------
def _feat_pool_kernel(img_ref, wc_ref, bc_ref, q_ref, o_ref):
    img_t = img_ref[0]                                              # (H*W, C_IN)
    feat = jnp.dot(img_t, wc_ref[...], preferred_element_type=jnp.float32)
    feat = jnp.maximum(feat + bc_ref[...], 0.0)                     # (H*W, 512)
    # pooled_T[p, c] = sum_s qT[p, s] * feat[s, c]
    o_ref[0] = jnp.dot(q_ref[...], feat,
                       preferred_element_type=jnp.float32)          # (49, 512)


# ---------------------------------------------------------------------------
# Kernel 2a: Linear (+ optional ReLU) with K tiled across the grid.
# Grid = (M/tm, N/tn, K/tk); K innermost ("arbitrary") with a VMEM f32
# accumulator initialized / finalized via pl.when.
# ---------------------------------------------------------------------------
def _linear_acc_kernel(x_ref, w_ref, b_ref, o_ref, acc_ref, *, act_relu):
    k = pl.program_id(2)

    @pl.when(k == 0)
    def _():
        acc_ref[...] = jnp.zeros_like(acc_ref)

    acc_ref[...] += jnp.dot(x_ref[...], w_ref[...],
                            preferred_element_type=jnp.float32)

    @pl.when(k == pl.num_programs(2) - 1)
    def _():
        r = acc_ref[...] + b_ref[...]
        if act_relu:
            r = jnp.maximum(r, 0.0)
        o_ref[...] = r.astype(o_ref.dtype)


# ---------------------------------------------------------------------------
# Kernel 2b: Linear (+ optional ReLU) with the full K contraction in one
# block (no accumulator, no reduction grid axis). Used when K fits VMEM.
# ---------------------------------------------------------------------------
def _linear_fullk_kernel(x_ref, w_ref, b_ref, o_ref, *, act_relu):
    r = jnp.dot(x_ref[...], w_ref[...], preferred_element_type=jnp.float32)
    r = r + b_ref[...]
    if act_relu:
        r = jnp.maximum(r, 0.0)
    o_ref[...] = r.astype(o_ref.dtype)


def pallas_linear(x, w, b, *, act_relu, tm, tn, tk=None, out_dtype=jnp.float32):
    M, K = x.shape
    Kw, N = w.shape
    assert K == Kw and M % tm == 0 and N % tn == 0
    if tk is None:
        tk = K
    assert K % tk == 0

    if tk == K:
        return pl.pallas_call(
            functools.partial(_linear_fullk_kernel, act_relu=act_relu),
            out_shape=jax.ShapeDtypeStruct((M, N), out_dtype),
            grid_spec=pltpu.PrefetchScalarGridSpec(
                num_scalar_prefetch=0,
                grid=(M // tm, N // tn),
                in_specs=[
                    pl.BlockSpec((tm, K), lambda i, j: (i, 0)),
                    pl.BlockSpec((K, tn), lambda i, j: (0, j)),
                    pl.BlockSpec((1, tn), lambda i, j: (0, j)),
                ],
                out_specs=pl.BlockSpec((tm, tn), lambda i, j: (i, j)),
            ),
            compiler_params=pltpu.CompilerParams(
                dimension_semantics=("parallel", "parallel"),
                vmem_limit_bytes=VMEM_LIMIT),
        )(x, w, b)

    return pl.pallas_call(
        functools.partial(_linear_acc_kernel, act_relu=act_relu),
        out_shape=jax.ShapeDtypeStruct((M, N), out_dtype),
        grid_spec=pltpu.PrefetchScalarGridSpec(
            num_scalar_prefetch=0,
            grid=(M // tm, N // tn, K // tk),
            in_specs=[
                pl.BlockSpec((tm, tk), lambda i, j, k: (i, k)),
                pl.BlockSpec((tk, tn), lambda i, j, k: (k, j)),
                pl.BlockSpec((1, tn), lambda i, j, k: (0, j)),
            ],
            out_specs=pl.BlockSpec((tm, tn), lambda i, j, k: (i, j)),
            scratch_shapes=[pltpu.VMEM((tm, tn), jnp.float32)],
        ),
        compiler_params=pltpu.CompilerParams(
            dimension_semantics=("parallel", "parallel", "arbitrary"),
            vmem_limit_bytes=VMEM_LIMIT),
    )(x, w, b)


# ---------------------------------------------------------------------------
# Glue: separable adaptive-pool factors (PyTorch AdaptiveAvgPool2d bins).
# ---------------------------------------------------------------------------
def _adaptive_pool_factor(in_size, out_size):
    m = np.zeros((out_size, in_size), np.float32)
    for i in range(out_size):
        s = (i * in_size) // out_size
        e = -((-(i + 1) * in_size) // out_size)      # ceil((i+1)*in/out)
        m[i, s:e] = 1.0 / (e - s)
    return m


def prepare_classifier_weights(params):
    """One-time weight prep: permute w1 rows to the (pos, channel) flatten
    order that matches the lane-dense (49, 512) pooled layout, pad the final
    layer to 1024 outputs, and cast weights to bf16 (biases stay f32)."""
    w1p = params['w1'].reshape(FEAT_C, POOL * POOL, HID)
    w1p = jnp.transpose(w1p, (1, 0, 2)).reshape(FLAT, HID)
    w3p = jnp.pad(params['w3'], ((0, 0), (0, NUM_CLASSES_PAD - NUM_CLASSES)))
    b3p = jnp.pad(params['b3'], ((0, 0), (0, NUM_CLASSES_PAD - NUM_CLASSES)))
    return dict(
        w1=w1p.astype(jnp.bfloat16), b1=params['b1'].astype(jnp.float32),
        w2=params['w2'].astype(jnp.bfloat16), b2=params['b2'].astype(jnp.float32),
        w3=w3p.astype(jnp.bfloat16), b3=b3p.astype(jnp.float32),
    )


def vgg_forward(img, params):
    B, C, H, W = img.shape
    assert C == C_IN

    prep = prepare_classifier_weights(params)

    # (B, H*W, C) layout so feat and pooled come out with a 512-wide last dim.
    img_t = jnp.transpose(img.reshape(B, C, H * W), (0, 2, 1)).astype(jnp.float32)

    # qT[p, s] with p = i*7+j, s = h*W+w (outer product of separable factors).
    ph = _adaptive_pool_factor(H, POOL)              # (7, H)
    pw = _adaptive_pool_factor(W, POOL)              # (7, W)
    qT = jnp.asarray(
        np.einsum('ih,jw->ijhw', ph, pw).reshape(POOL * POOL, H * W))  # (49, H*W)

    pooled = pl.pallas_call(
        _feat_pool_kernel,
        out_shape=jax.ShapeDtypeStruct((B, POOL * POOL, FEAT_C), jnp.float32),
        grid=(B,),
        in_specs=[
            pl.BlockSpec((1, H * W, C_IN), lambda b: (b, 0, 0)),
            pl.BlockSpec((C_IN, FEAT_C), lambda b: (0, 0)),
            pl.BlockSpec((1, FEAT_C), lambda b: (0, 0)),
            pl.BlockSpec((POOL * POOL, H * W), lambda b: (0, 0)),
        ],
        out_specs=pl.BlockSpec((1, POOL * POOL, FEAT_C), lambda b: (b, 0, 0)),
        compiler_params=pltpu.CompilerParams(
            dimension_semantics=("parallel",)),
    )(img_t, params['wc'].T, params['bc'], qT)

    # Flatten in (pos, channel) order -> matches the permuted w1 rows, and is
    # numerically identical to torch's x.view(B, -1) with the original w1.
    x = pooled.reshape(B, FLAT)

    # Batch padding derived from B (no silent B<=8 assumption); tm grows with
    # batch up to 256 MXU rows.
    m_pad = max(8, -(-B // 8) * 8)
    if m_pad > 256:
        m_pad = -(-B // 256) * 256
        tm = 256
    else:
        tm = m_pad
    x = jnp.pad(x, ((0, m_pad - B), (0, 0))).astype(jnp.bfloat16)

    # classifier (Dropout == identity at inference); bf16 operands, f32 accum.
    h1 = pallas_linear(x, prep['w1'], prep['b1'], act_relu=True,
                       tm=tm, tn=1024, tk=6272, out_dtype=jnp.bfloat16)
    h2 = pallas_linear(h1, prep['w2'], prep['b2'], act_relu=True,
                       tm=tm, tn=1024, tk=None, out_dtype=jnp.bfloat16)
    out = pallas_linear(h2, prep['w3'], prep['b3'], act_relu=False,
                        tm=tm, tn=512, tk=None, out_dtype=jnp.float32)
    return out[:B, :NUM_CLASSES]


# ---------------------------------------------------------------------------
# Deterministic parameter init (matches the torch init scheme in spirit).
# ---------------------------------------------------------------------------
def init_params(key):
    ks = jax.random.split(key, 8)
    kaiming = math.sqrt(2.0 / FEAT_C)   # kaiming_normal_, fan_out, relu (1x1 conv)
    return dict(
        wc=jax.random.normal(ks[0], (FEAT_C, C_IN), jnp.float32) * kaiming,
        bc=jax.random.normal(ks[1], (1, FEAT_C), jnp.float32) * 0.01,
        w1=jax.random.normal(ks[2], (FLAT, HID), jnp.float32) * 0.01,
        b1=jax.random.normal(ks[3], (1, HID), jnp.float32) * 0.01,
        w2=jax.random.normal(ks[4], (HID, HID), jnp.float32) * 0.01,
        b2=jax.random.normal(ks[5], (1, HID), jnp.float32) * 0.01,
        w3=jax.random.normal(ks[6], (HID, NUM_CLASSES), jnp.float32) * 0.01,
        b3=jax.random.normal(ks[7], (1, NUM_CLASSES), jnp.float32) * 0.01,
    )


# ---------------------------------------------------------------------------
# Pure NumPy reference (literal conv -> adaptive pool -> flatten -> MLP),
# using the ORIGINAL torch flatten order and un-permuted f32 weights.
# ---------------------------------------------------------------------------
def reference_numpy(img, p):
    B, C, H, W = img.shape
    feat = np.einsum('oc,bchw->bohw', p['wc'], img) + p['bc'].reshape(1, -1, 1, 1)
    feat = np.maximum(feat, 0.0)
    pooled = np.zeros((B, FEAT_C, POOL, POOL), np.float32)
    for i in range(POOL):
        sh, eh = (i * H) // POOL, -((-(i + 1) * H) // POOL)
        for j in range(POOL):
            sw, ew = (j * W) // POOL, -((-(j + 1) * W) // POOL)
            pooled[:, :, i, j] = feat[:, :, sh:eh, sw:ew].mean(axis=(2, 3))
    x = pooled.reshape(B, -1)
    h1 = np.maximum(x @ p['w1'] + p['b1'], 0.0)
    h2 = np.maximum(h1 @ p['w2'] + p['b2'], 0.0)
    return h2 @ p['w3'] + p['b3']


if __name__ == "__main__":
    key = jax.random.PRNGKey(0)
    k_img, k_par = jax.random.split(key, 2)

    B, H, W = 2, 16, 16
    img = jax.random.normal(k_img, (B, C_IN, H, W), jnp.float32)
    params = init_params(k_par)

    out = vgg_forward(img, params)
    out = jax.block_until_ready(out)
    assert out.shape == (B, NUM_CLASSES)

    ref = reference_numpy(np.asarray(img), {k: np.asarray(v) for k, v in params.items()})
    # bf16 weights/activations (f32 accumulation) -> allow a few-% drift.
    np.testing.assert_allclose(np.asarray(out), ref, rtol=3e-2, atol=5e-3)
    print("KERNEL_OK")
</pallas_src>

<mosaic_0001>
module attributes {stable_mosaic.version = 11 : i64} {
  func.func @_feat_pool_kernel(%arg0: i32, %arg1: memref<1x256x3xf32, #tpu.memory_space<vmem>>, %arg2: memref<3x512xf32, #tpu.memory_space<vmem>>, %arg3: memref<1x512xf32, #tpu.memory_space<vmem>>, %arg4: memref<49x256xf32, #tpu.memory_space<vmem>>, %arg5: memref<1x49x512xf32, #tpu.memory_space<vmem>>) attributes {dimension_semantics = [#tpu.dimension_semantics<parallel>], iteration_bounds = array<i64: 2>, scalar_prefetch = 0 : i64, scratch_operands = 0 : i64, tpu.core_type = #tpu.core_type<tc>, window_params = [{transform_indices = @transform_0, window_bounds = array<i64: 1, 256, 3>}, {pipeline_mode = #tpu.pipeline_mode<synchronous>, transform_indices = @transform_1, window_bounds = array<i64: 3, 512>}, {pipeline_mode = #tpu.pipeline_mode<synchronous>, transform_indices = @transform_2, window_bounds = array<i64: 1, 512>}, {pipeline_mode = #tpu.pipeline_mode<synchronous>, transform_indices = @transform_3, window_bounds = array<i64: 49, 256>}, {transform_indices = @transform_4, window_bounds = array<i64: 1, 49, 512>}]} {
    %c0 = arith.constant 0 : index
    %c0_0 = arith.constant 0 : index
    %c0_1 = arith.constant 0 : index
    %0 = vector.load %arg1[%c0, %c0_0, %c0_1] : memref<1x256x3xf32, #tpu.memory_space<vmem>>, vector<1x256x3xf32>
    %1 = vector.shape_cast %0 : vector<1x256x3xf32> to vector<256x3xf32>
    %c0_2 = arith.constant 0 : index
    %c0_3 = arith.constant 0 : index
    %2 = vector.load %arg2[%c0_2, %c0_3] : memref<3x512xf32, #tpu.memory_space<vmem>>, vector<3x512xf32>
    %cst = arith.constant dense<0.000000e+00> : vector<256x512xf32>
    %3 = tpu.matmul %1, %2, %cst {dimension_numbers = #tpu.dot_dimension_numbers<[1], [0], [0], [1], [0, 0, 1, 1], [], []>} : vector<256x3xf32>, vector<3x512xf32>, vector<256x512xf32> -> vector<256x512xf32>
    %c0_4 = arith.constant 0 : index
    %c0_5 = arith.constant 0 : index
    %4 = vector.load %arg3[%c0_4, %c0_5] : memref<1x512xf32, #tpu.memory_space<vmem>>, vector<1x512xf32>
    %5 = vector.broadcast %4 : vector<1x512xf32> to vector<256x512xf32>
    %6 = arith.addf %3, %5 : vector<256x512xf32>
    %cst_6 = arith.constant 0.000000e+00 : f32
    %7 = vector.broadcast %cst_6 : f32 to vector<256x512xf32>
    %8 = arith.maximumf %6, %7 : vector<256x512xf32>
    %c0_7 = arith.constant 0 : index
    %c0_8 = arith.constant 0 : index
    %9 = vector.load %arg4[%c0_7, %c0_8] : memref<49x256xf32, #tpu.memory_space<vmem>>, vector<49x256xf32>
    %cst_9 = arith.constant dense<0.000000e+00> : vector<49x512xf32>
    %10 = tpu.matmul %9, %8, %cst_9 {dimension_numbers = #tpu.dot_dimension_numbers<[1], [0], [0], [1], [0, 0, 1, 1], [], []>} : vector<49x256xf32>, vector<256x512xf32>, vector<49x512xf32> -> vector<49x512xf32>
    %c0_10 = arith.constant 0 : index
    %c0_11 = arith.constant 0 : index
    %c0_12 = arith.constant 0 : index
    %11 = vector.load %arg5[%c0_10, %c0_11, %c0_12] : memref<1x49x512xf32, #tpu.memory_space<vmem>>, vector<1x49x512xf32>
    %12 = vector.shape_cast %11 : vector<1x49x512xf32> to vector<49x512xf32>
    %13 = vector.shape_cast %10 : vector<49x512xf32> to vector<1x49x512xf32>
    tpu.vector_store %arg5[%c0_10, %c0_11, %c0_12], %13 {strides = array<i32>} : memref<1x49x512xf32, #tpu.memory_space<vmem>>, vector<1x49x512xf32>,
    return
  }
  func.func @transform_0(%arg0: i32) -> (i32, i32, i32) {
    %c0_i32 = arith.constant 0 : i32
    %c0_i32_0 = arith.constant 0 : i32
    %c0_i32_1 = arith.constant 0 : i32
    return %arg0, %c0_i32, %c0_i32_0 : i32, i32, i32
  }
  func.func @transform_1(%arg0: i32) -> (i32, i32) {
    %c0_i32 = arith.constant 0 : i32
    %c0_i32_0 = arith.constant 0 : i32
    %c0_i32_1 = arith.constant 0 : i32
    return %c0_i32, %c0_i32_0 : i32, i32
  }
  func.func @transform_2(%arg0: i32) -> (i32, i32) {
    %c0_i32 = arith.constant 0 : i32
    %c0_i32_0 = arith.constant 0 : i32
    %c0_i32_1 = arith.constant 0 : i32
    return %c0_i32, %c0_i32_0 : i32, i32
  }
  func.func @transform_3(%arg0: i32) -> (i32, i32) {
    %c0_i32 = arith.constant 0 : i32
    %c0_i32_0 = arith.constant 0 : i32
    %c0_i32_1 = arith.constant 0 : i32
    return %c0_i32, %c0_i32_0 : i32, i32
  }
  func.func @transform_4(%arg0: i32) -> (i32, i32, i32) {
    %c0_i32 = arith.constant 0 : i32
    %c0_i32_0 = arith.constant 0 : i32
    %c0_i32_1 = arith.constant 0 : i32
    return %arg0, %c0_i32, %c0_i32_0 : i32, i32, i32
  }
}

</mosaic_0001>

<bundles_post_ra>
// kernel: tpu_custom_call.1
= control target key start
LH: loop header
LB: loop body
LE: loop exit
PB: predicated region body
PF: predicated region fallthrough
CT: control target
= control target key end

     0   :  { %s1570_s15 = smov 0   ;;  %s1970_s0 = inlined_call_operand.vmem [shape: f32[2,256,3], index: 0, kind: input, shape index: {}]   ;;  %s1971_s1 = inlined_call_operand.vmem [shape: f32[3,512], index: 1, kind: input, shape index: {}]   ;;  %s1972_s2 = inlined_call_operand.vmem [shape: f32[1,512], index: 2, kind: input, shape index: {}]   ;;  %s1973_s3 = inlined_call_operand.vmem [shape: f32[49,256], index: 3, kind: input, shape index: {}]   ;;  %s1974_s4 = inlined_call_operand.vmem [shape: f32[2,49,512], index: 4, kind: output, shape index: {}]  }
   0x1 LB: > { %s1317_s16 = sadd.s32 4294967295, %s1542_s15   ;;  %p1321_p0 = scmp.ge.s32.totalorder %s1542_s15, 1  ;;  %s1542_s15 = sphi %s1570_s15, %s14_s15  }
   0x2   : > { %p162_p1 = scmp.lt.s32.totalorder %s1542_s15, 3 }
   0x4   : > { %p163_p2 = pnand %p1321_p0, %p162_p1 }
   0x5   : > { %v230_v0 = vld [vmem:[%s1971_s1] sm:$0x77] (!%p163_p2)  ;;  %vm355_vm0 = vcmask (!%p163_p2), 1042432   ;;  %v231_v1 = vld [vmem:[%s1971_s1 + $0x8] sm:$0x77] (!%p163_p2)  ;;  %v1544_v4 = vmov (!%p163_p2), 0.0   ;;  %v234_v37 = vlaneseq (!%p163_p2) }
   0x6   : > { %166 = sbr.rel (%p163_p2) target bundleno = 602 (0x25a), region = 36  ;;  %v256_v2 = vcombine.high (!%p163_p2), %v230_v0, %v230_v0  ;;  %v257_v3 = vcombine.high (!%p163_p2), %v231_v1, %v231_v1  ;;  %428 = vmatprep.mubr.f32.mxu0 (!%p163_p2), %v1544_v4  ;;  %685 = vmatprep.mubr.f32.mxu1 (!%p163_p2), %v1544_v4  ;;  %p188_p3 = scmp.lt.s32.totalorder (!%p163_p2), %s1317_s16, 1  ;;  %vm258_vm1 = vcmask (!%p163_p2), 23552   ;;  %v232_v41 = vld [vmem:[%s1972_s2] sm:$0xf] (!%p163_p2)  ;;  %v1007_v62 = vld [vmem:[%s1973_s3 + $0x8] sm:$0xff] (!%p163_p2) }
   0x7   : > { %v235_v38 = vshrl.u32 (!%p163_p2), %v234_v37, 7 }
   0x8   : > { %1325 = vmatprep.subr.msk.mxu0 (!%p163_p2), %vm355_vm0, %v256_v2  ;;  %1359 = vmatprep.subr.msk.mxu1 (!%p163_p2), %vm355_vm0, %v257_v3 }
   0x9   : > { %1326 = vmatpush1.msk.msra.mxu0 (!%p163_p2), %vm355_vm0, %v230_v0  ;;  %1360 = vmatpush1.msk.msra.mxu1 (!%p163_p2), %vm355_vm0, %v231_v1  ;;  %v236_v39 = vsub.s32 (!%p163_p2), 0, %v235_v38  ;;  %v244_v40 = vsub.s32 (!%p163_p2), 2, %v235_v38  ;;  %v240_v42 = vsub.s32 (!%p163_p2), 1, %v235_v38  ;;  %v248_v43 = vsub.s32 (!%p163_p2), 3, %v235_v38 }
   0xb   : > { %v1755_v44 = vrot.slane (!%p163_p2), %v232_v41, %v236_v39  ;;  %v1757_v45 = vrot.slane (!%p163_p2), %v232_v41, %v244_v40  ;;  %v1759_v48 = vrot.slane (!%p163_p2), %v232_v41, %v240_v42  ;;  %v1761_v49 = vrot.slane (!%p163_p2), %v232_v41, %v248_v43 }
   0xd   : > { %s1976_s16 = smov (!%p188_p3, %s1317_s16), 1 }
   0xe   : > { %s1395_s21 = sshll.u32 %s1976_s16, 8  ;;  %s1524_s5 = smul.u32 224, %s1976_s16 }
   0xf   : > { %s1592_s24 = scalar_lea.vmem %s1970_s0, %s1395_s21 }
  0x10   : > { %v198_v5 = vld [vmem:[%s1592_s24] sm:$0xff]  ;;  %v199_v6 = vld [vmem:[%s1592_s24 + $0x8] sm:$0xff]  ;;  %v200_v7 = vld [vmem:[%s1592_s24 + $0x10] sm:$0xff]  ;;  %s1937_s8 = scalar_lea.vmem %s1974_s4, %s1524_s5 }
  0x11   : > { %1327 = vmatmul.mubr.msk.f32.vlgmr.msra.gmra.mrb[0].mxu0 %vm258_vm1, %v198_v5  ;;  %1361 = vmatmul.mubr.msk.f32.vlgmr.msra.gmra.mrb[0].mxu1 %vm258_vm1, %v198_v5  ;;  %v201_v8 = vld [vmem:[%s1592_s24 + $0x18] sm:$0xff]  ;;  %v202_v9 = vld [vmem:[%s1592_s24 + $0x20] sm:$0xff]  ;;  %v203_v10 = vld [vmem:[%s1592_s24 + $0x28] sm:$0xff] }
  0x12   : > { %434 = vmatprep.mubr.f32.mxu0 %v1544_v4  ;;  %691 = vmatprep.mubr.f32.mxu1 %v1544_v4  ;;  %v204_v11 = vld [vmem:[%s1592_s24 + $0x30] sm:$0xff]  ;;  %v205_v12 = vld [vmem:[%s1592_s24 + $0x38] sm:$0xff]  ;;  %v206_v13 = vld [vmem:[%s1592_s24 + $0x40] sm:$0xff] }
  0x13   : > { %v207_v14 = vld [vmem:[%s1592_s24 + $0x48] sm:$0xff]  ;;  %v208_v15 = vld [vmem:[%s1592_s24 + $0x50] sm:$0xff]  ;;  %v209_v16 = vld [vmem:[%s1592_s24 + $0x58] sm:$0xff] }
  0x14   : > { %v210_v17 = vld [vmem:[%s1592_s24 + $0x60] sm:$0xff]  ;;  %v211_v18 = vld [vmem:[%s1592_s24 + $0x68] sm:$0xff]  ;;  %v212_v19 = vld [vmem:[%s1592_s24 + $0x70] sm:$0xff] }
  0x15   : > { %1328 = vmatmul.mubr.msk.f32.gmra.mrb[2].mxu0 %vm258_vm1, %v199_v6  ;;  %1362 = vmatmul.mubr.msk.f32.gmra.mrb[2].mxu1 %vm258_vm1, %v199_v6  ;;  %v213_v20 = vld [vmem:[%s1592_s24 + $0x78] sm:$0xff]  ;;  %v214_v21 = vld [vmem:[%s1592_s24 + $0x80] sm:$0xff]  ;;  %v215_v22 = vld [vmem:[%s1592_s24 + $0x88] sm:$0xff] }
  0x16   : > { %440 = vmatprep.mubr.f32.mxu0 %v1544_v4  ;;  %697 = vmatprep.mubr.f32.mxu1 %v1544_v4  ;;  %v216_v23 = vld [vmem:[%s1592_s24 + $0x90] sm:$0xff]  ;;  %v217_v24 = vld [vmem:[%s1592_s24 + $0x98] sm:$0xff]  ;;  %v218_v25 = vld [vmem:[%s1592_s24 + $0xa0] sm:$0xff] }
  0x17   : > { %v219_v26 = vld [vmem:[%s1592_s24 + $0xa8] sm:$0xff]  ;;  %v220_v27 = vld [vmem:[%s1592_s24 + $0xb0] sm:$0xff]  ;;  %v221_v28 = vld [vmem:[%s1592_s24 + $0xb8] sm:$0xff] }
  0x18   : > { %v222_v29 = vld [vmem:[%s1592_s24 + $0xc0] sm:$0xff]  ;;  %v223_v30 = vld [vmem:[%s1592_s24 + $0xc8] sm:$0xff]  ;;  %v224_v31 = vld [vmem:[%s1592_s24 + $0xd0] sm:$0xff] }
  0x19   : > { %1329 = vmatmul.mubr.msk.f32.gmra.mrb[4].mxu0 %vm258_vm1, %v200_v7  ;;  %1363 = vmatmul.mubr.msk.f32.gmra.mrb[4].mxu1 %vm258_vm1, %v200_v7  ;;  %v225_v32 = vld [vmem:[%s1592_s24 + $0xd8] sm:$0xff]  ;;  %v226_v33 = vld [vmem:[%s1592_s24 + $0xe0] sm:$0xff]  ;;  %v227_v34 = vld [vmem:[%s1592_s24 + $0xe8] sm:$0xff] }
  0x1a   : > { %446 = vmatprep.mubr.f32.mxu0 %v1544_v4  ;;  %703 = vmatprep.mubr.f32.mxu1 %v1544_v4  ;;  %v228_v35 = vld [vmem:[%s1592_s24 + $0xf0] sm:$0xff]  ;;  %v229_v36 = vld [vmem:[%s1592_s24 + $0xf8] sm:$0xff] }
  0x1d   : > { %1330 = vmatmul.mubr.msk.f32.gmra.mrb[6].mxu0 %vm258_vm1, %v201_v8  ;;  %1364 = vmatmul.mubr.msk.f32.gmra.mrb[6].mxu1 %vm258_vm1, %v201_v8 }
  0x1e   : > { %452 = vmatprep.mubr.f32.mxu0 %v1544_v4  ;;  %709 = vmatprep.mubr.f32.mxu1 %v1544_v4 }
  0x21   : > { %1331 = vmatmul.mubr.msk.f32.gmra.mrb[8].mxu0 %vm258_vm1, %v202_v9  ;;  %1365 = vmatmul.mubr.msk.f32.gmra.mrb[8].mxu1 %vm258_vm1, %v202_v9 }
  0x22   : > { %458 = vmatprep.mubr.f32.mxu0 %v1544_v4  ;;  %715 = vmatprep.mubr.f32.mxu1 %v1544_v4 }
  0x25   : > { %1332 = vmatmul.mubr.msk.f32.gmra.mrb[10].mxu0 %vm258_vm1, %v203_v10  ;;  %1366 = vmatmul.mubr.msk.f32.gmra.mrb[10].mxu1 %vm258_vm1, %v203_v10 }
  0x26   : > { %464 = vmatprep.mubr.f32.mxu0 %v1544_v4  ;;  %721 = vmatprep.mubr.f32.mxu1 %v1544_v4 }
  0x29   : > { %1333 = vmatmul.mubr.msk.f32.gmra.mrb[12].mxu0 %vm258_vm1, %v204_v11  ;;  %1367 = vmatmul.mubr.msk.f32.gmra.mrb[12].mxu1 %vm258_vm1, %v204_v11 }
  0x2a   : > { %470 = vmatprep.mubr.f32.mxu0 %v1544_v4  ;;  %727 = vmatprep.mubr.f32.mxu1 %v1544_v4 }
  0x2d   : > { %1334 = vmatmul.mubr.msk.f32.gmra.mrb[14].mxu0 %vm258_vm1, %v205_v12  ;;  %1368 = vmatmul.mubr.msk.f32.gmra.mrb[14].mxu1 %vm258_vm1, %v205_v12 }
  0x2e   : > { %476 = vmatprep.mubr.f32.mxu0 %v1544_v4  ;;  %733 = vmatprep.mubr.f32.mxu1 %v1544_v4 }
  0x31   : > { %1335 = vmatmul.mubr.msk.f32.gmra.mrb[16].mxu0 %vm258_vm1, %v206_v13  ;;  %1369 = vmatmul.mubr.msk.f32.gmra.mrb[16].mxu1 %vm258_vm1, %v206_v13 }
  0x32   : > { %482 = vmatprep.mubr.f32.mxu0 %v1544_v4  ;;  %739 = vmatprep.mubr.f32.mxu1 %v1544_v4 }
  0x35   : > { %1336 = vmatmul.mubr.msk.f32.gmra.mrb[18].mxu0 %vm258_vm1, %v207_v14  ;;  %1370 = vmatmul.mubr.msk.f32.gmra.mrb[18].mxu1 %vm258_vm1, %v207_v14 }
  0x36   : > { %488 = vmatprep.mubr.f32.mxu0 %v1544_v4  ;;  %745 = vmatprep.mubr.f32.mxu1 %v1544_v4 }
  0x39   : > { %1337 = vmatmul.mubr.msk.f32.gmra.mrb[20].mxu0 %vm258_vm1, %v208_v15  ;;  %1371 = vmatmul.mubr.msk.f32.gmra.mrb[20].mxu1 %vm258_vm1, %v208_v15 }
  0x3a   : > { %494 = vmatprep.mubr.f32.mxu0 %v1544_v4  ;;  %751 = vmatprep.mubr.f32.mxu1 %v1544_v4 }
  0x3d   : > { %1338 = vmatmul.mubr.msk.f32.gmra.mrb[22].mxu0 %vm258_vm1, %v209_v16  ;;  %1372 = vmatmul.mubr.msk.f32.gmra.mrb[22].mxu1 %vm258_vm1, %v209_v16 }
  0x3e   : > { %500 = vmatprep.mubr.f32.mxu0 %v1544_v4  ;;  %757 = vmatprep.mubr.f32.mxu1 %v1544_v4 }
  0x41   : > { %1339 = vmatmul.mubr.msk.f32.gmra.mrb[24].mxu0 %vm258_vm1, %v210_v17  ;;  %1373 = vmatmul.mubr.msk.f32.gmra.mrb[24].mxu1 %vm258_vm1, %v210_v17 }
  0x42   : > { %506 = vmatprep.mubr.f32.mxu0 %v1544_v4  ;;  %763 = vmatprep.mubr.f32.mxu1 %v1544_v4 }
  0x45   : > { %1340 = vmatmul.mubr.msk.f32.gmra.mrb[26].mxu0 %vm258_vm1, %v211_v18  ;;  %1374 = vmatmul.mubr.msk.f32.gmra.mrb[26].mxu1 %vm258_vm1, %v211_v18 }
  0x46   : > { %512 = vmatprep.mubr.f32.mxu0 %v1544_v4  ;;  %769 = vmatprep.mubr.f32.mxu1 %v1544_v4 }
  0x49   : > { %1341 = vmatmul.mubr.msk.f32.gmra.mrb[28].mxu0 %vm258_vm1, %v212_v19  ;;  %1375 = vmatmul.mubr.msk.f32.gmra.mrb[28].mxu1 %vm258_vm1, %v212_v19 }
  0x4a   : > { %518 = vmatprep.mubr.f32.mxu0 %v1544_v4  ;;  %775 = vmatprep.mubr.f32.mxu1 %v1544_v4 }
  0x4d   : > { %1342 = vmatmul.mubr.msk.f32.gmra.mrb[30].mxu0 %vm258_vm1, %v213_v20  ;;  %1376 = vmatmul.mubr.msk.f32.gmra.mrb[30].mxu1 %vm258_vm1, %v213_v20 }
  0x4e   : > { %524 = vmatprep.mubr.f32.mxu0 %v1544_v4  ;;  %781 = vmatprep.mubr.f32.mxu1 %v1544_v4 }
  0x51   : > { %1343 = vmatmul.mubr.msk.f32.gmra.mrb[32].mxu0 %vm258_vm1, %v214_v21  ;;  %1377 = vmatmul.mubr.msk.f32.gmra.mrb[32].mxu1 %vm258_vm1, %v214_v21 }
  0x52   : > { %530 = vmatprep.mubr.f32.mxu0 %v1544_v4  ;;  %787 = vmatprep.mubr.f32.mxu1 %v1544_v4 }
  0x55   : > { %1344 = vmatmul.mubr.msk.f32.gmra.mrb[34].mxu0 %vm258_vm1, %v215_v22  ;;  %1378 = vmatmul.mubr.msk.f32.gmra.mrb[34].mxu1 %vm258_vm1, %v215_v22 }
  0x56   : > { %536 = vmatprep.mubr.f32.mxu0 %v1544_v4  ;;  %793 = vmatprep.mubr.f32.mxu1 %v1544_v4 }
  0x59   : > { %1345 = vmatmul.mubr.msk.f32.gmra.mrb[36].mxu0 %vm258_vm1, %v216_v23  ;;  %1379 = vmatmul.mubr.msk.f32.gmra.mrb[36].mxu1 %vm258_vm1, %v216_v23 }
  0x5a   : > { %542 = vmatprep.mubr.f32.mxu0 %v1544_v4  ;;  %799 = vmatprep.mubr.f32.mxu1 %v1544_v4 }
  0x5d   : > { %1346 = vmatmul.mubr.msk.f32.gmra.mrb[38].mxu0 %vm258_vm1, %v217_v24  ;;  %1380 = vmatmul.mubr.msk.f32.gmra.mrb[38].mxu1 %vm258_vm1, %v217_v24 }
  0x5e   : > { %548 = vmatprep.mubr.f32.mxu0 %v1544_v4  ;;  %805 = vmatprep.mubr.f32.mxu1 %v1544_v4 }
  0x61   : > { %1347 = vmatmul.mubr.msk.f32.gmra.mrb[40].mxu0 %vm258_vm1, %v218_v25  ;;  %1381 = vmatmul.mubr.msk.f32.gmra.mrb[40].mxu1 %vm258_vm1, %v218_v25 }
  0x62   : > { %554 = vmatprep.mubr.f32.mxu0 %v1544_v4  ;;  %811 = vmatprep.mubr.f32.mxu1 %v1544_v4 }
  0x65   : > { %1348 = vmatmul.mubr.msk.f32.gmra.mrb[42].mxu0 %vm258_vm1, %v219_v26  ;;  %1382 = vmatmul.mubr.msk.f32.gmra.mrb[42].mxu1 %vm258_vm1, %v219_v26 }
  0x66   : > { %560 = vmatprep.mubr.f32.mxu0 %v1544_v4  ;;  %817 = vmatprep.mubr.f32.mxu1 %v1544_v4 }
  0x69   : > { %1349 = vmatmul.mubr.msk.f32.gmra.mrb[44].mxu0 %vm258_vm1, %v220_v27  ;;  %1383 = vmatmul.mubr.msk.f32.gmra.mrb[44].mxu1 %vm258_vm1, %v220_v27 }
  0x6a   : > { %566 = vmatprep.mubr.f32.mxu0 %v1544_v4  ;;  %823 = vmatprep.mubr.f32.mxu1 %v1544_v4 }
  0x6d   : > { %1350 = vmatmul.mubr.msk.f32.gmra.mrb[46].mxu0 %vm258_vm1, %v221_v28  ;;  %1384 = vmatmul.mubr.msk.f32.gmra.mrb[46].mxu1 %vm258_vm1, %v221_v28 }
  0x6e   : > { %572 = vmatprep.mubr.f32.mxu0 %v1544_v4  ;;  %829 = vmatprep.mubr.f32.mxu1 %v1544_v4 }
  0x71   : > { %1351 = vmatmul.mubr.msk.f32.gmra.mrb[48].mxu0 %vm258_vm1, %v222_v29  ;;  %1385 = vmatmul.mubr.msk.f32.gmra.mrb[48].mxu1 %vm258_vm1, %v222_v29 }
  0x72   : > { %578 = vmatprep.mubr.f32.mxu0 %v1544_v4  ;;  %835 = vmatprep.mubr.f32.mxu1 %v1544_v4 }
  0x75   : > { %1352 = vmatmul.mubr.msk.f32.gmra.mrb[50].mxu0 %vm258_vm1, %v223_v30  ;;  %1386 = vmatmul.mubr.msk.f32.gmra.mrb[50].mxu1 %vm258_vm1, %v223_v30 }
  0x76   : > { %584 = vmatprep.mubr.f32.mxu0 %v1544_v4  ;;  %841 = vmatprep.mubr.f32.mxu1 %v1544_v4 }
  0x79   : > { %1353 = vmatmul.mubr.msk.f32.gmra.mrb[52].mxu0 %vm258_vm1, %v224_v31  ;;  %1387 = vmatmul.mubr.msk.f32.gmra.mrb[52].mxu1 %vm258_vm1, %v224_v31 }
  0x7a   : > { %590 = vmatprep.mubr.f32.mxu0 %v1544_v4  ;;  %847 = vmatprep.mubr.f32.mxu1 %v1544_v4 }
  0x7d   : > { %1354 = vmatmul.mubr.msk.f32.gmra.mrb[54].mxu0 %vm258_vm1, %v225_v32  ;;  %1388 = vmatmul.mubr.msk.f32.gmra.mrb[54].mxu1 %vm258_vm1, %v225_v32 }
  0x7e   : > { %596 = vmatprep.mubr.f32.mxu0 %v1544_v4  ;;  %853 = vmatprep.mubr.f32.mxu1 %v1544_v4 }
  0x81   : > { %1355 = vmatmul.mubr.msk.f32.gmra.mrb[56].mxu0 %vm258_vm1, %v226_v33  ;;  %1389 = vmatmul.mubr.msk.f32.gmra.mrb[56].mxu1 %vm258_vm1, %v226_v33 }
  0x82   : > { %602 = vmatprep.mubr.f32.mxu0 %v1544_v4  ;;  %859 = vmatprep.mubr.f32.mxu1 %v1544_v4 }
  0x85   : > { %1356 = vmatmul.mubr.msk.f32.gmra.mrb[58].mxu0 %vm258_vm1, %v227_v34  ;;  %1390 = vmatmul.mubr.msk.f32.gmra.mrb[58].mxu1 %vm258_vm1, %v227_v34 }
  0x86   : > { %608 = vmatprep.mubr.f32.mxu0 %v1544_v4  ;;  %865 = vmatprep.mubr.f32.mxu1 %v1544_v4 }
  0x89   : > { %1357 = vmatmul.mubr.msk.f32.gmra.mrb[60].mxu0 %vm258_vm1, %v228_v35  ;;  %1391 = vmatmul.mubr.msk.f32.gmra.mrb[60].mxu1 %vm258_vm1, %v228_v35 }
  0x8a   : > { %614 = vmatprep.mubr.f32.mxu0 %v1544_v4  ;;  %871 = vmatprep.mubr.f32.mxu1 %v1544_v4 }
  0x8d   : > { %1358 = vmatmul.mubr.msk.f32.gmra.mrb[62].mxu0 %vm258_vm1, %v229_v36  ;;  %1392 = vmatmul.mubr.msk.f32.gmra.mrb[62].mxu1 %vm258_vm1, %v229_v36 }
  0x8e   : > { %1084 = vmatprep.mubr.f32.mxu0 %v1007_v62  ;;  %1191 = vmatprep.mubr.f32.mxu1 %v1007_v62 }
  0xe4   : > { %v430_v46 = vpop.f32.mrb[0].mxu0  ;;  %v687_v47 = vpop.f32.mrb[0].mxu1 }
  0xe5   : > { %v432_v50 = vpop.f32.mrb[1].mxu0  ;;  %v689_v51 = vpop.f32.mrb[1].mxu1  ;;  %v431_v52 = vadd.f32 %v430_v46, %v1755_v44  ;;  %v688_v53 = vadd.f32 %v687_v47, %v1757_v45 }
  0xe6   : > { %v433_v54 = vadd.f32 %v432_v50, %v1759_v48  ;;  %v690_v55 = vadd.f32 %v689_v51, %v1761_v49 }
  0xe7   : > { %v878_v1 = vmax.f32 %v431_v52, 0.0  ;;  %v880_v2 = vmax.f32 %v688_v53, 0.0 }
  0xe8   : > { %v436_v56 = vpop.f32.mrb[2].mxu0  ;;  %v693_v57 = vpop.f32.mrb[2].mxu1  ;;  %v879_v5 = vmax.f32 %v433_v54, 0.0  ;;  %v881_v6 = vmax.f32 %v690_v55, 0.0 }
  0xe9   : > { %v437_v58 = vadd.f32 %v436_v56, %v1755_v44  ;;  %v694_v59 = vadd.f32 %v693_v57, %v1757_v45  ;;  %v438_v60 = vpop.f32.mrb[3].mxu0  ;;  %v695_v61 = vpop.f32.mrb[3].mxu1 }
  0xea   : > { %v439_v63 = vadd.f32 %v438_v60, %v1759_v48  ;;  %v696_v0 = vadd.f32 %v695_v61, %v1761_v49 }
  0xeb   : > { %v882_v3 = vmax.f32 %v437_v58, 0.0  ;;  %v884_v4 = vmax.f32 %v694_v59, 0.0 }
  0xec   : > { %v883_v7 = vmax.f32 %v439_v63, 0.0  ;;  %v885_v8 = vmax.f32 %v696_v0, 0.0  ;;  %v442_v9 = vpop.f32.mrb[4].mxu0  ;;  %v699_v10 = vpop.f32.mrb[4].mxu1 }
  0xed   : > { %v1398_v11 = vpack.c.bf16 %v882_v3, %v878_v1  ;;  %v1462_v12 = vpack.c.bf16 %v884_v4, %v880_v2  ;;  %v444_v13 = vpop.f32.mrb[5].mxu0  ;;  %v701_v14 = vpop.f32.mrb[5].mxu1  ;;  %v443_v17 = vadd.f32 %v442_v9, %v1755_v44  ;;  %v700_v18 = vadd.f32 %v699_v10, %v1757_v45 }
  0xee   : > { %v1396_v15 = vpack.c.bf16 %v883_v7, %v879_v5  ;;  %v1460_v16 = vpack.c.bf16 %v885_v8, %v881_v6  ;;  %v445_v19 = vadd.f32 %v444_v13, %v1759_v48  ;;  %v702_v20 = vadd.f32 %v701_v14, %v1761_v49 }
  0xef   : > { %v886_v29 = vmax.f32 %v443_v17, 0.0  ;;  %v888_v30 = vmax.f32 %v700_v18, 0.0 }
  0xf0   : > { %v448_v21 = vpop.f32.mrb[6].mxu0  ;;  %v705_v22 = vpop.f32.mrb[6].mxu1  ;;  %1397 = vmatprep.subr.bf16.mxu0 %v1396_v15  ;;  %1461 = vmatprep.subr.bf16.mxu1 %v1460_v16  ;;  %v887_v33 = vmax.f32 %v445_v19, 0.0  ;;  %v889_v34 = vmax.f32 %v702_v20, 0.0 }
  0xf1   : > { %v449_v23 = vadd.f32 %v448_v21, %v1755_v44  ;;  %v706_v24 = vadd.f32 %v705_v22, %v1757_v45  ;;  %v450_v25 = vpop.f32.mrb[7].mxu0  ;;  %v707_v26 = vpop.f32.mrb[7].mxu1  ;;  %1399 = vmatpush1.bf16.msra.mxu0 %v1398_v11  ;;  %1463 = vmatpush1.bf16.msra.mxu1 %v1462_v12 }
  0xf2   : > { %v451_v27 = vadd.f32 %v450_v25, %v1759_v48  ;;  %v708_v28 = vadd.f32 %v707_v26, %v1761_v49 }
  0xf3   : > { %v890_v31 = vmax.f32 %v449_v23, 0.0  ;;  %v892_v32 = vmax.f32 %v706_v24, 0.0 }
  0xf4   : > { %v891_v35 = vmax.f32 %v451_v27, 0.0  ;;  %v893_v36 = vmax.f32 %v708_v28, 0.0  ;;  %v454_v37 = vpop.f32.mrb[8].mxu0  ;;  %v711_v38 = vpop.f32.mrb[8].mxu1 }
  0xf5   : > { %v1402_v39 = vpack.c.bf16 %v890_v31, %v886_v29  ;;  %v1466_v40 = vpack.c.bf16 %v892_v32, %v888_v30  ;;  %v456_v41 = vpop.f32.mrb[9].mxu0  ;;  %v713_v42 = vpop.f32.mrb[9].mxu1  ;;  %v455_v47 = vadd.f32 %v454_v37, %v1755_v44  ;;  %v712_v50 = vadd.f32 %v711_v38, %v1757_v45 }
  0xf6   : > { %v1400_v43 = vpack.c.bf16 %v891_v35, %v887_v33  ;;  %v1464_v46 = vpack.c.bf16 %v893_v36, %v889_v34  ;;  %v457_v51 = vadd.f32 %v456_v41, %v1759_v48  ;;  %v714_v52 = vadd.f32 %v713_v42, %v1761_v49 }
  0xf7   : > { %v894_v61 = vmax.f32 %v455_v47, 0.0  ;;  %v896_v62 = vmax.f32 %v712_v50, 0.0 }
  0xf8   : > { %v460_v53 = vpop.f32.mrb[10].mxu0  ;;  %v717_v54 = vpop.f32.mrb[10].mxu1  ;;  %1401 = vmatprep.subr.bf16.mxu0 %v1400_v43  ;;  %1465 = vmatprep.subr.bf16.mxu1 %v1464_v46  ;;  %v895_v1 = vmax.f32 %v457_v51, 0.0  ;;  %v897_v2 = vmax.f32 %v714_v52, 0.0 }
  0xf9   : > { %v461_v55 = vadd.f32 %v460_v53, %v1755_v44  ;;  %v718_v56 = vadd.f32 %v717_v54, %v1757_v45  ;;  %v462_v57 = vpop.f32.mrb[11].mxu0  ;;  %v719_v58 = vpop.f32.mrb[11].mxu1  ;;  %1403 = vmatpush1.bf16.msra.mxu0 %v1402_v39  ;;  %1467 = vmatpush1.bf16.msra.mxu1 %v1466_v40 }
  0xfa   : > { %v463_v59 = vadd.f32 %v462_v57, %v1759_v48  ;;  %v720_v60 = vadd.f32 %v719_v58, %v1761_v49 }
  0xfb   : > { %v898_v63 = vmax.f32 %v461_v55, 0.0  ;;  %v900_v0 = vmax.f32 %v718_v56, 0.0 }
  0xfc   : > { %v899_v3 = vmax.f32 %v463_v59, 0.0  ;;  %v901_v4 = vmax.f32 %v720_v60, 0.0  ;;  %v466_v5 = vpop.f32.mrb[12].mxu0  ;;  %v723_v6 = vpop.f32.mrb[12].mxu1 }
  0xfd   : > { %v1406_v7 = vpack.c.bf16 %v898_v63, %v894_v61  ;;  %v1470_v8 = vpack.c.bf16 %v900_v0, %v896_v62  ;;  %v468_v9 = vpop.f32.mrb[13].mxu0  ;;  %v725_v10 = vpop.f32.mrb[13].mxu1  ;;  %v467_v13 = vadd.f32 %v466_v5, %v1755_v44  ;;  %v724_v14 = vadd.f32 %v723_v6, %v1757_v45 }
  0xfe   : > { %v1404_v11 = vpack.c.bf16 %v899_v3, %v895_v1  ;;  %v1468_v12 = vpack.c.bf16 %v901_v4, %v897_v2  ;;  %v469_v15 = vadd.f32 %v468_v9, %v1759_v48  ;;  %v726_v16 = vadd.f32 %v725_v10, %v1761_v49 }
  0xff   : > { %v902_v25 = vmax.f32 %v467_v13, 0.0  ;;  %v904_v26 = vmax.f32 %v724_v14, 0.0 }
 0x100   : > { %v472_v17 = vpop.f32.mrb[14].mxu0  ;;  %v729_v18 = vpop.f32.mrb[14].mxu1  ;;  %1405 = vmatprep.subr.bf16.mxu0 %v1404_v11  ;;  %1469 = vmatprep.subr.bf16.mxu1 %v1468_v12  ;;  %v903_v29 = vmax.f32 %v469_v15, 0.0  ;;  %v905_v30 = vmax.f32 %v726_v16, 0.0 }
 0x101   : > { %v473_v19 = vadd.f32 %v472_v17, %v1755_v44  ;;  %v730_v20 = vadd.f32 %v729_v18, %v1757_v45  ;;  %v474_v21 = vpop.f32.mrb[15].mxu0  ;;  %v731_v22 = vpop.f32.mrb[15].mxu1  ;;  %1407 = vmatpush1.bf16.msra.mxu0 %v1406_v7  ;;  %1471 = vmatpush1.bf16.msra.mxu1 %v1470_v8 }
 0x102   : > { %v475_v23 = vadd.f32 %v474_v21, %v1759_v48  ;;  %v732_v24 = vadd.f32 %v731_v22, %v1761_v49 }
 0x103   : > { %v906_v27 = vmax.f32 %v473_v19, 0.0  ;;  %v908_v28 = vmax.f32 %v730_v20, 0.0 }
 0x104   : > { %v907_v31 = vmax.f32 %v475_v23, 0.0  ;;  %v909_v32 = vmax.f32 %v732_v24, 0.0  ;;  %v478_v33 = vpop.f32.mrb[16].mxu0  ;;  %v735_v34 = vpop.f32.mrb[16].mxu1 }
 0x105   : > { %v1410_v35 = vpack.c.bf16 %v906_v27, %v902_v25  ;;  %v1474_v36 = vpack.c.bf16 %v908_v28, %v904_v26  ;;  %v480_v37 = vpop.f32.mrb[17].mxu0  ;;  %v737_v38 = vpop.f32.mrb[17].mxu1  ;;  %v479_v41 = vadd.f32 %v478_v33, %v1755_v44  ;;  %v736_v42 = vadd.f32 %v735_v34, %v1757_v45 }
 0x106   : > { %v1408_v39 = vpack.c.bf16 %v907_v31, %v903_v29  ;;  %v1472_v40 = vpack.c.bf16 %v909_v32, %v905_v30  ;;  %v481_v43 = vadd.f32 %v480_v37, %v1759_v48  ;;  %v738_v46 = vadd.f32 %v737_v38, %v1761_v49 }
 0x107   : > { %v910_v57 = vmax.f32 %v479_v41, 0.0  ;;  %v912_v58 = vmax.f32 %v736_v42, 0.0 }
 0x108   : > { %v484_v47 = vpop.f32.mrb[18].mxu0  ;;  %v741_v50 = vpop.f32.mrb[18].mxu1  ;;  %1409 = vmatprep.subr.bf16.mxu0 %v1408_v39  ;;  %1473 = vmatprep.subr.bf16.mxu1 %v1472_v40  ;;  %v911_v61 = vmax.f32 %v481_v43, 0.0  ;;  %v913_v62 = vmax.f32 %v738_v46, 0.0 }
 0x109   : > { %v485_v51 = vadd.f32 %v484_v47, %v1755_v44  ;;  %v742_v52 = vadd.f32 %v741_v50, %v1757_v45  ;;  %v486_v53 = vpop.f32.mrb[19].mxu0  ;;  %v743_v54 = vpop.f32.mrb[19].mxu1  ;;  %1411 = vmatpush1.bf16.msra.mxu0 %v1410_v35  ;;  %1475 = vmatpush1.bf16.msra.mxu1 %v1474_v36 }
 0x10a   : > { %v487_v55 = vadd.f32 %v486_v53, %v1759_v48  ;;  %v744_v56 = vadd.f32 %v743_v54, %v1761_v49 }
 0x10b   : > { %v914_v59 = vmax.f32 %v485_v51, 0.0  ;;  %v916_v60 = vmax.f32 %v742_v52, 0.0 }
 0x10c   : > { %v915_v63 = vmax.f32 %v487_v55, 0.0  ;;  %v917_v0 = vmax.f32 %v744_v56, 0.0  ;;  %v490_v1 = vpop.f32.mrb[20].mxu0  ;;  %v747_v2 = vpop.f32.mrb[20].mxu1 }
 0x10d   : > { %v1414_v3 = vpack.c.bf16 %v914_v59, %v910_v57  ;;  %v1478_v4 = vpack.c.bf16 %v916_v60, %v912_v58  ;;  %v492_v5 = vpop.f32.mrb[21].mxu0  ;;  %v749_v6 = vpop.f32.mrb[21].mxu1  ;;  %v491_v9 = vadd.f32 %v490_v1, %v1755_v44  ;;  %v748_v10 = vadd.f32 %v747_v2, %v1757_v45 }
 0x10e   : > { %v1412_v7 = vpack.c.bf16 %v915_v63, %v911_v61  ;;  %v1476_v8 = vpack.c.bf16 %v917_v0, %v913_v62  ;;  %v493_v11 = vadd.f32 %v492_v5, %v1759_v48  ;;  %v750_v12 = vadd.f32 %v749_v6, %v1761_v49 }
 0x10f   : > { %v918_v21 = vmax.f32 %v491_v9, 0.0  ;;  %v920_v22 = vmax.f32 %v748_v10, 0.0 }
 0x110   : > { %v496_v13 = vpop.f32.mrb[22].mxu0  ;;  %v753_v14 = vpop.f32.mrb[22].mxu1  ;;  %1413 = vmatprep.subr.bf16.mxu0 %v1412_v7  ;;  %1477 = vmatprep.subr.bf16.mxu1 %v1476_v8  ;;  %v919_v25 = vmax.f32 %v493_v11, 0.0  ;;  %v921_v26 = vmax.f32 %v750_v12, 0.0 }
 0x111   : > { %v497_v15 = vadd.f32 %v496_v13, %v1755_v44  ;;  %v754_v16 = vadd.f32 %v753_v14, %v1757_v45  ;;  %v498_v17 = vpop.f32.mrb[23].mxu0  ;;  %v755_v18 = vpop.f32.mrb[23].mxu1  ;;  %1415 = vmatpush1.bf16.msra.mxu0 %v1414_v3  ;;  %1479 = vmatpush1.bf16.msra.mxu1 %v1478_v4 }
 0x112   : > { %v499_v19 = vadd.f32 %v498_v17, %v1759_v48  ;;  %v756_v20 = vadd.f32 %v755_v18, %v1761_v49 }
 0x113   : > { %v922_v23 = vmax.f32 %v497_v15, 0.0  ;;  %v924_v24 = vmax.f32 %v754_v16, 0.0 }
 0x114   : > { %v923_v27 = vmax.f32 %v499_v19, 0.0  ;;  %v925_v28 = vmax.f32 %v756_v20, 0.0  ;;  %v502_v29 = vpop.f32.mrb[24].mxu0  ;;  %v759_v30 = vpop.f32.mrb[24].mxu1 }
 0x115   : > { %v1418_v31 = vpack.c.bf16 %v922_v23, %v918_v21  ;;  %v1482_v32 = vpack.c.bf16 %v924_v24, %v920_v22  ;;  %v504_v33 = vpop.f32.mrb[25].mxu0  ;;  %v761_v34 = vpop.f32.mrb[25].mxu1  ;;  %v503_v37 = vadd.f32 %v502_v29, %v1755_v44  ;;  %v760_v38 = vadd.f32 %v759_v30, %v1757_v45 }
 0x116   : > { %v1416_v35 = vpack.c.bf16 %v923_v27, %v919_v25  ;;  %v1480_v36 = vpack.c.bf16 %v925_v28, %v921_v26  ;;  %v505_v39 = vadd.f32 %v504_v33, %v1759_v48  ;;  %v762_v40 = vadd.f32 %v761_v34, %v1761_v49 }
 0x117   : > { %v926_v53 = vmax.f32 %v503_v37, 0.0  ;;  %v928_v54 = vmax.f32 %v760_v38, 0.0 }
 0x118   : > { %v508_v41 = vpop.f32.mrb[26].mxu0  ;;  %v765_v42 = vpop.f32.mrb[26].mxu1  ;;  %1417 = vmatprep.subr.bf16.mxu0 %v1416_v35  ;;  %1481 = vmatprep.subr.bf16.mxu1 %v1480_v36  ;;  %v927_v57 = vmax.f32 %v505_v39, 0.0  ;;  %v929_v58 = vmax.f32 %v762_v40, 0.0 }
 0x119   : > { %v509_v43 = vadd.f32 %v508_v41, %v1755_v44  ;;  %v766_v46 = vadd.f32 %v765_v42, %v1757_v45  ;;  %v510_v47 = vpop.f32.mrb[27].mxu0  ;;  %v767_v50 = vpop.f32.mrb[27].mxu1  ;;  %1419 = vmatpush1.bf16.msra.mxu0 %v1418_v31  ;;  %1483 = vmatpush1.bf16.msra.mxu1 %v1482_v32 }
 0x11a   : > { %v511_v51 = vadd.f32 %v510_v47, %v1759_v48  ;;  %v768_v52 = vadd.f32 %v767_v50, %v1761_v49 }
 0x11b   : > { %v930_v55 = vmax.f32 %v509_v43, 0.0  ;;  %v932_v56 = vmax.f32 %v766_v46, 0.0 }
 0x11c   : > { %v931_v59 = vmax.f32 %v511_v51, 0.0  ;;  %v933_v60 = vmax.f32 %v768_v52, 0.0  ;;  %v514_v61 = vpop.f32.mrb[28].mxu0  ;;  %v771_v62 = vpop.f32.mrb[28].mxu1 }
 0x11d   : > { %v1422_v63 = vpack.c.bf16 %v930_v55, %v926_v53  ;;  %v1486_v0 = vpack.c.bf16 %v932_v56, %v928_v54  ;;  %v516_v1 = vpop.f32.mrb[29].mxu0  ;;  %v773_v2 = vpop.f32.mrb[29].mxu1  ;;  %v515_v5 = vadd.f32 %v514_v61, %v1755_v44  ;;  %v772_v6 = vadd.f32 %v771_v62, %v1757_v45 }
 0x11e   : > { %v1420_v3 = vpack.c.bf16 %v931_v59, %v927_v57  ;;  %v1484_v4 = vpack.c.bf16 %v933_v60, %v929_v58  ;;  %v517_v7 = vadd.f32 %v516_v1, %v1759_v48  ;;  %v774_v8 = vadd.f32 %v773_v2, %v1761_v49 }
 0x11f   : > { %v934_v17 = vmax.f32 %v515_v5, 0.0  ;;  %v936_v18 = vmax.f32 %v772_v6, 0.0 }
 0x120   : > { %v520_v9 = vpop.f32.mrb[30].mxu0  ;;  %v777_v10 = vpop.f32.mrb[30].mxu1  ;;  %1421 = vmatprep.subr.bf16.mxu0 %v1420_v3  ;;  %1485 = vmatprep.subr.bf16.mxu1 %v1484_v4  ;;  %v935_v21 = vmax.f32 %v517_v7, 0.0  ;;  %v937_v22 = vmax.f32 %v774_v8, 0.0 }
 0x121   : > { %v521_v11 = vadd.f32 %v520_v9, %v1755_v44  ;;  %v778_v12 = vadd.f32 %v777_v10, %v1757_v45  ;;  %v522_v13 = vpop.f32.mrb[31].mxu0  ;;  %v779_v14 = vpop.f32.mrb[31].mxu1  ;;  %1423 = vmatpush1.bf16.msra.mxu0 %v1422_v63  ;;  %1487 = vmatpush1.bf16.msra.mxu1 %v1486_v0 }
 0x122   : > { %v523_v15 = vadd.f32 %v522_v13, %v1759_v48  ;;  %v780_v16 = vadd.f32 %v779_v14, %v1761_v49 }
 0x123   : > { %v938_v19 = vmax.f32 %v521_v11, 0.0  ;;  %v940_v20 = vmax.f32 %v778_v12, 0.0 }
 0x124   : > { %v939_v23 = vmax.f32 %v523_v15, 0.0  ;;  %v941_v24 = vmax.f32 %v780_v16, 0.0  ;;  %v526_v25 = vpop.f32.mrb[32].mxu0  ;;  %v783_v26 = vpop.f32.mrb[32].mxu1 }
 0x125   : > { %v1426_v27 = vpack.c.bf16 %v938_v19, %v934_v17  ;;  %v1490_v28 = vpack.c.bf16 %v940_v20, %v936_v18  ;;  %v528_v29 = vpop.f32.mrb[33].mxu0  ;;  %v785_v30 = vpop.f32.mrb[33].mxu1  ;;  %v527_v33 = vadd.f32 %v526_v25, %v1755_v44  ;;  %v784_v34 = vadd.f32 %v783_v26, %v1757_v45 }
 0x126   : > { %v1424_v31 = vpack.c.bf16 %v939_v23, %v935_v21  ;;  %v1488_v32 = vpack.c.bf16 %v941_v24, %v937_v22  ;;  %v529_v35 = vadd.f32 %v528_v29, %v1759_v48  ;;  %v786_v36 = vadd.f32 %v785_v30, %v1761_v49 }
 0x127   : > { %v942_v47 = vmax.f32 %v527_v33, 0.0  ;;  %v944_v50 = vmax.f32 %v784_v34, 0.0 }
 0x128   : > { %v532_v37 = vpop.f32.mrb[34].mxu0  ;;  %v789_v38 = vpop.f32.mrb[34].mxu1  ;;  %1425 = vmatprep.subr.bf16.mxu0 %v1424_v31  ;;  %1489 = vmatprep.subr.bf16.mxu1 %v1488_v32  ;;  %v943_v53 = vmax.f32 %v529_v35, 0.0  ;;  %v945_v54 = vmax.f32 %v786_v36, 0.0 }
 0x129   : > { %v533_v39 = vadd.f32 %v532_v37, %v1755_v44  ;;  %v790_v40 = vadd.f32 %v789_v38, %v1757_v45  ;;  %v534_v41 = vpop.f32.mrb[35].mxu0  ;;  %v791_v42 = vpop.f32.mrb[35].mxu1  ;;  %1427 = vmatpush1.bf16.msra.mxu0 %v1426_v27  ;;  %1491 = vmatpush1.bf16.msra.mxu1 %v1490_v28 }
 0x12a   : > { %v535_v43 = vadd.f32 %v534_v41, %v1759_v48  ;;  %v792_v46 = vadd.f32 %v791_v42, %v1761_v49 }
 0x12b   : > { %v946_v51 = vmax.f32 %v533_v39, 0.0  ;;  %v948_v52 = vmax.f32 %v790_v40, 0.0 }
 0x12c   : > { %v947_v55 = vmax.f32 %v535_v43, 0.0  ;;  %v949_v56 = vmax.f32 %v792_v46, 0.0  ;;  %v538_v57 = vpop.f32.mrb[36].mxu0  ;;  %v795_v58 = vpop.f32.mrb[36].mxu1 }
 0x12d   : > { %v1430_v59 = vpack.c.bf16 %v946_v51, %v942_v47  ;;  %v1494_v60 = vpack.c.bf16 %v948_v52, %v944_v50  ;;  %v540_v61 = vpop.f32.mrb[37].mxu0  ;;  %v797_v62 = vpop.f32.mrb[37].mxu1  ;;  %v539_v1 = vadd.f32 %v538_v57, %v1755_v44  ;;  %v796_v2 = vadd.f32 %v795_v58, %v1757_v45 }
 0x12e   : > { %v1428_v63 = vpack.c.bf16 %v947_v55, %v943_v53  ;;  %v1492_v0 = vpack.c.bf16 %v949_v56, %v945_v54  ;;  %v541_v3 = vadd.f32 %v540_v61, %v1759_v48  ;;  %v798_v4 = vadd.f32 %v797_v62, %v1761_v49 }
 0x12f   : > { %v950_v13 = vmax.f32 %v539_v1, 0.0  ;;  %v952_v14 = vmax.f32 %v796_v2, 0.0 }
 0x130   : > { %v544_v5 = vpop.f32.mrb[38].mxu0  ;;  %v801_v6 = vpop.f32.mrb[38].mxu1  ;;  %1429 = vmatprep.subr.bf16.mxu0 %v1428_v63  ;;  %1493 = vmatprep.subr.bf16.mxu1 %v1492_v0  ;;  %v951_v17 = vmax.f32 %v541_v3, 0.0  ;;  %v953_v18 = vmax.f32 %v798_v4, 0.0 }
 0x131   : > { %v545_v7 = vadd.f32 %v544_v5, %v1755_v44  ;;  %v802_v8 = vadd.f32 %v801_v6, %v1757_v45  ;;  %v546_v9 = vpop.f32.mrb[39].mxu0  ;;  %v803_v10 = vpop.f32.mrb[39].mxu1  ;;  %1431 = vmatpush1.bf16.msra.mxu0 %v1430_v59  ;;  %1495 = vmatpush1.bf16.msra.mxu1 %v1494_v60 }
 0x132   : > { %v547_v11 = vadd.f32 %v546_v9, %v1759_v48  ;;  %v804_v12 = vadd.f32 %v803_v10, %v1761_v49 }
 0x133   : > { %v954_v15 = vmax.f32 %v545_v7, 0.0  ;;  %v956_v16 = vmax.f32 %v802_v8, 0.0 }
 0x134   : > { %v955_v19 = vmax.f32 %v547_v11, 0.0  ;;  %v957_v20 = vmax.f32 %v804_v12, 0.0  ;;  %v550_v21 = vpop.f32.mrb[40].mxu0  ;;  %v807_v22 = vpop.f32.mrb[40].mxu1 }
 0x135   : > { %v1434_v23 = vpack.c.bf16 %v954_v15, %v950_v13  ;;  %v1498_v24 = vpack.c.bf16 %v956_v16, %v952_v14  ;;  %v552_v25 = vpop.f32.mrb[41].mxu0  ;;  %v809_v26 = vpop.f32.mrb[41].mxu1  ;;  %v551_v29 = vadd.f32 %v550_v21, %v1755_v44  ;;  %v808_v30 = vadd.f32 %v807_v22, %v1757_v45 }
 0x136   : > { %v1432_v27 = vpack.c.bf16 %v955_v19, %v951_v17  ;;  %v1496_v28 = vpack.c.bf16 %v957_v20, %v953_v18  ;;  %v553_v31 = vadd.f32 %v552_v25, %v1759_v48  ;;  %v810_v32 = vadd.f32 %v809_v26, %v1761_v49 }
 0x137   : > { %v958_v41 = vmax.f32 %v551_v29, 0.0  ;;  %v960_v42 = vmax.f32 %v808_v30, 0.0 }
 0x138   : > { %v556_v33 = vpop.f32.mrb[42].mxu0  ;;  %v813_v34 = vpop.f32.mrb[42].mxu1  ;;  %1433 = vmatprep.subr.bf16.mxu0 %v1432_v27  ;;  %1497 = vmatprep.subr.bf16.mxu1 %v1496_v28  ;;  %v959_v47 = vmax.f32 %v553_v31, 0.0  ;;  %v961_v50 = vmax.f32 %v810_v32, 0.0 }
 0x139   : > { %v557_v35 = vadd.f32 %v556_v33, %v1755_v44  ;;  %v814_v36 = vadd.f32 %v813_v34, %v1757_v45  ;;  %v558_v37 = vpop.f32.mrb[43].mxu0  ;;  %v815_v38 = vpop.f32.mrb[43].mxu1  ;;  %1435 = vmatpush1.bf16.msra.mxu0 %v1434_v23  ;;  %1499 = vmatpush1.bf16.msra.mxu1 %v1498_v24 }
 0x13a   : > { %v559_v39 = vadd.f32 %v558_v37, %v1759_v48  ;;  %v816_v40 = vadd.f32 %v815_v38, %v1761_v49 }
 0x13b   : > { %v962_v43 = vmax.f32 %v557_v35, 0.0  ;;  %v964_v46 = vmax.f32 %v814_v36, 0.0 }
 0x13c   : > { %v963_v51 = vmax.f32 %v559_v39, 0.0  ;;  %v965_v52 = vmax.f32 %v816_v40, 0.0  ;;  %v562_v53 = vpop.f32.mrb[44].mxu0  ;;  %v819_v54 = vpop.f32.mrb[44].mxu1 }
 0x13d   : > { %v1438_v55 = vpack.c.bf16 %v962_v43, %v958_v41  ;;  %v1502_v56 = vpack.c.bf16 %v964_v46, %v960_v42  ;;  %v564_v57 = vpop.f32.mrb[45].mxu0  ;;  %v821_v58 = vpop.f32.mrb[45].mxu1  ;;  %v563_v61 = vadd.f32 %v562_v53, %v1755_v44  ;;  %v820_v62 = vadd.f32 %v819_v54, %v1757_v45 }
 0x13e   : > { %v1436_v59 = vpack.c.bf16 %v963_v51, %v959_v47  ;;  %v1500_v60 = vpack.c.bf16 %v965_v52, %v961_v50  ;;  %v565_v63 = vadd.f32 %v564_v57, %v1759_v48  ;;  %v822_v0 = vadd.f32 %v821_v58, %v1761_v49 }
 0x13f   : > { %v966_v9 = vmax.f32 %v563_v61, 0.0  ;;  %v968_v10 = vmax.f32 %v820_v62, 0.0 }
 0x140   : > { %v568_v1 = vpop.f32.mrb[46].mxu0  ;;  %v825_v2 = vpop.f32.mrb[46].mxu1  ;;  %1437 = vmatprep.subr.bf16.mxu0 %v1436_v59  ;;  %1501 = vmatprep.subr.bf16.mxu1 %v1500_v60  ;;  %v967_v13 = vmax.f32 %v565_v63, 0.0  ;;  %v969_v14 = vmax.f32 %v822_v0, 0.0 }
 0x141   : > { %v569_v3 = vadd.f32 %v568_v1, %v1755_v44  ;;  %v826_v4 = vadd.f32 %v825_v2, %v1757_v45  ;;  %v570_v5 = vpop.f32.mrb[47].mxu0  ;;  %v827_v6 = vpop.f32.mrb[47].mxu1  ;;  %1439 = vmatpush1.bf16.msra.mxu0 %v1438_v55  ;;  %1503 = vmatpush1.bf16.msra.mxu1 %v1502_v56 }
 0x142   : > { %v571_v7 = vadd.f32 %v570_v5, %v1759_v48  ;;  %v828_v8 = vadd.f32 %v827_v6, %v1761_v49 }
 0x143   : > { %v970_v11 = vmax.f32 %v569_v3, 0.0  ;;  %v972_v12 = vmax.f32 %v826_v4, 0.0 }
 0x144   : > { %v971_v15 = vmax.f32 %v571_v7, 0.0  ;;  %v973_v16 = vmax.f32 %v828_v8, 0.0  ;;  %v574_v17 = vpop.f32.mrb[48].mxu0  ;;  %v831_v18 = vpop.f32.mrb[48].mxu1 }
 0x145   : > { %v1442_v19 = vpack.c.bf16 %v970_v11, %v966_v9  ;;  %v1506_v20 = vpack.c.bf16 %v972_v12, %v968_v10  ;;  %v576_v21 = vpop.f32.mrb[49].mxu0  ;;  %v833_v22 = vpop.f32.mrb[49].mxu1  ;;  %v575_v25 = vadd.f32 %v574_v17, %v1755_v44  ;;  %v832_v26 = vadd.f32 %v831_v18, %v1757_v45 }
 0x146   : > { %v1440_v23 = vpack.c.bf16 %v971_v15, %v967_v13  ;;  %v1504_v24 = vpack.c.bf16 %v973_v16, %v969_v14  ;;  %v577_v27 = vadd.f32 %v576_v21, %v1759_v48  ;;  %v834_v28 = vadd.f32 %v833_v22, %v1761_v49 }
 0x147   : > { %v974_v37 = vmax.f32 %v575_v25, 0.0  ;;  %v976_v38 = vmax.f32 %v832_v26, 0.0 }
 0x148   : > { %v580_v29 = vpop.f32.mrb[50].mxu0  ;;  %v837_v30 = vpop.f32.mrb[50].mxu1  ;;  %1441 = vmatprep.subr.bf16.mxu0 %v1440_v23  ;;  %1505 = vmatprep.subr.bf16.mxu1 %v1504_v24  ;;  %v975_v41 = vmax.f32 %v577_v27, 0.0  ;;  %v977_v42 = vmax.f32 %v834_v28, 0.0 }
 0x149   : > { %v581_v31 = vadd.f32 %v580_v29, %v1755_v44  ;;  %v838_v32 = vadd.f32 %v837_v30, %v1757_v45  ;;  %v582_v33 = vpop.f32.mrb[51].mxu0  ;;  %v839_v34 = vpop.f32.mrb[51].mxu1  ;;  %1443 = vmatpush1.bf16.msra.mxu0 %v1442_v19  ;;  %1507 = vmatpush1.bf16.msra.mxu1 %v1506_v20 }
 0x14a   : > { %v583_v35 = vadd.f32 %v582_v33, %v1759_v48  ;;  %v840_v36 = vadd.f32 %v839_v34, %v1761_v49 }
 0x14b   : > { %v978_v39 = vmax.f32 %v581_v31, 0.0  ;;  %v980_v40 = vmax.f32 %v838_v32, 0.0 }
 0x14c   : > { %v979_v43 = vmax.f32 %v583_v35, 0.0  ;;  %v981_v46 = vmax.f32 %v840_v36, 0.0  ;;  %v586_v47 = vpop.f32.mrb[52].mxu0  ;;  %v843_v50 = vpop.f32.mrb[52].mxu1 }
 0x14d   : > { %v1446_v51 = vpack.c.bf16 %v978_v39, %v974_v37  ;;  %v1510_v52 = vpack.c.bf16 %v980_v40, %v976_v38  ;;  %v588_v53 = vpop.f32.mrb[53].mxu0  ;;  %v845_v54 = vpop.f32.mrb[53].mxu1  ;;  %v587_v57 = vadd.f32 %v586_v47, %v1755_v44  ;;  %v844_v58 = vadd.f32 %v843_v50, %v1757_v45 }
 0x14e   : > { %v1444_v55 = vpack.c.bf16 %v979_v43, %v975_v41  ;;  %v1508_v56 = vpack.c.bf16 %v981_v46, %v977_v42  ;;  %v589_v59 = vadd.f32 %v588_v53, %v1759_v48  ;;  %v846_v60 = vadd.f32 %v845_v54, %v1761_v49 }
 0x14f   : > { %v982_v5 = vmax.f32 %v587_v57, 0.0  ;;  %v984_v6 = vmax.f32 %v844_v58, 0.0 }
 0x150   : > { %v592_v61 = vpop.f32.mrb[54].mxu0  ;;  %v849_v62 = vpop.f32.mrb[54].mxu1  ;;  %1445 = vmatprep.subr.bf16.mxu0 %v1444_v55  ;;  %1509 = vmatprep.subr.bf16.mxu1 %v1508_v56  ;;  %v983_v9 = vmax.f32 %v589_v59, 0.0  ;;  %v985_v10 = vmax.f32 %v846_v60, 0.0 }
 0x151   : > { %v593_v63 = vadd.f32 %v592_v61, %v1755_v44  ;;  %v850_v0 = vadd.f32 %v849_v62, %v1757_v45  ;;  %v594_v1 = vpop.f32.mrb[55].mxu0  ;;  %v851_v2 = vpop.f32.mrb[55].mxu1  ;;  %1447 = vmatpush1.bf16.msra.mxu0 %v1446_v51  ;;  %1511 = vmatpush1.bf16.msra.mxu1 %v1510_v52 }
 0x152   : > { %v595_v3 = vadd.f32 %v594_v1, %v1759_v48  ;;  %v852_v4 = vadd.f32 %v851_v2, %v1761_v49 }
 0x153   : > { %v986_v7 = vmax.f32 %v593_v63, 0.0  ;;  %v988_v8 = vmax.f32 %v850_v0, 0.0 }
 0x154   : > { %v987_v11 = vmax.f32 %v595_v3, 0.0  ;;  %v989_v12 = vmax.f32 %v852_v4, 0.0  ;;  %v598_v13 = vpop.f32.mrb[56].mxu0  ;;  %v855_v14 = vpop.f32.mrb[56].mxu1 }
 0x155   : > { %v1450_v15 = vpack.c.bf16 %v986_v7, %v982_v5  ;;  %v1514_v16 = vpack.c.bf16 %v988_v8, %v984_v6  ;;  %v600_v17 = vpop.f32.mrb[57].mxu0  ;;  %v857_v18 = vpop.f32.mrb[57].mxu1  ;;  %v599_v21 = vadd.f32 %v598_v13, %v1755_v44  ;;  %v856_v22 = vadd.f32 %v855_v14, %v1757_v45  ;;  %v1010_v13 = vld [vmem:[%s1973_s3 + $0x20] sm:$0xff]  ;;  %v1013_v14 = vld [vmem:[%s1973_s3 + $0x38] sm:$0xff] }
 0x156   : > { %v1448_v19 = vpack.c.bf16 %v987_v11, %v983_v9  ;;  %v1512_v20 = vpack.c.bf16 %v989_v12, %v985_v10  ;;  %v601_v23 = vadd.f32 %v600_v17, %v1759_v48  ;;  %v858_v24 = vadd.f32 %v857_v18, %v1761_v49  ;;  %v1008_v11 = vld [vmem:[%s1973_s3 + $0x10] sm:$0xff]  ;;  %v1011_v12 = vld [vmem:[%s1973_s3 + $0x28] sm:$0xff]  ;;  %v1014_v17 = vld [vmem:[%s1973_s3 + $0x40] sm:$0xff] }
 0x157   : > { %v990_v33 = vmax.f32 %v599_v21, 0.0  ;;  %v992_v34 = vmax.f32 %v856_v22, 0.0  ;;  %v1017_v18 = vld [vmem:[%s1973_s3 + $0x58] sm:$0xff]  ;;  %v1018_v21 = vld [vmem:[%s1973_s3 + $0x60] sm:$0x1] }
 0x158   : > { %v604_v25 = vpop.f32.mrb[58].mxu0  ;;  %v861_v26 = vpop.f32.mrb[58].mxu1  ;;  %1449 = vmatprep.subr.bf16.mxu0 %v1448_v19  ;;  %1513 = vmatprep.subr.bf16.mxu1 %v1512_v20  ;;  %v991_v37 = vmax.f32 %v601_v23, 0.0  ;;  %v993_v38 = vmax.f32 %v858_v24, 0.0  ;;  %v1016_v19 = vld [vmem:[%s1973_s3 + $0x50] sm:$0xff] }
 0x159   : > { %v605_v27 = vadd.f32 %v604_v25, %v1755_v44  ;;  %v862_v28 = vadd.f32 %v861_v26, %v1757_v45  ;;  %v606_v29 = vpop.f32.mrb[59].mxu0  ;;  %v863_v30 = vpop.f32.mrb[59].mxu1  ;;  %1451 = vmatpush1.bf16.msra.mxu0 %v1450_v15  ;;  %1515 = vmatpush1.bf16.msra.mxu1 %v1514_v16  ;;  %v1012_v15 = vld [vmem:[%s1973_s3 + $0x30] sm:$0xff]  ;;  %v1015_v16 = vld [vmem:[%s1973_s3 + $0x48] sm:$0xff] }
 0x15a   : > { %v607_v31 = vadd.f32 %v606_v29, %v1759_v48  ;;  %v864_v32 = vadd.f32 %v863_v30, %v1761_v49  ;;  %v1019_v20 = vld [vmem:[%s1973_s3 + $0x68] sm:$0x1] }
 0x15b   : > { %v994_v35 = vmax.f32 %v605_v27, 0.0  ;;  %v996_v36 = vmax.f32 %v862_v28, 0.0 }
 0x15c   : > { %v995_v39 = vmax.f32 %v607_v31, 0.0  ;;  %v997_v40 = vmax.f32 %v864_v32, 0.0  ;;  %v610_v41 = vpop.f32.mrb[60].mxu0  ;;  %v867_v42 = vpop.f32.mrb[60].mxu1 }
 0x15d   : > { %v1454_v43 = vpack.c.bf16 %v994_v35, %v990_v33  ;;  %v1518_v46 = vpack.c.bf16 %v996_v36, %v992_v34  ;;  %v612_v47 = vpop.f32.mrb[61].mxu0  ;;  %v869_v50 = vpop.f32.mrb[61].mxu1  ;;  %v611_v53 = vadd.f32 %v610_v41, %v1755_v44  ;;  %v868_v54 = vadd.f32 %v867_v42, %v1757_v45 }
 0x15e   : > { %v1452_v51 = vpack.c.bf16 %v995_v39, %v991_v37  ;;  %v1516_v52 = vpack.c.bf16 %v997_v40, %v993_v38  ;;  %v613_v55 = vadd.f32 %v612_v47, %v1759_v48  ;;  %v870_v56 = vadd.f32 %v869_v50, %v1761_v49 }
 0x15f   : > { %v998_v1 = vmax.f32 %v611_v53, 0.0  ;;  %v1000_v2 = vmax.f32 %v868_v54, 0.0 }
 0x160   : > { %v616_v57 = vpop.f32.mrb[62].mxu0  ;;  %v873_v58 = vpop.f32.mrb[62].mxu1  ;;  %1453 = vmatprep.subr.bf16.mxu0 %v1452_v51  ;;  %1517 = vmatprep.subr.bf16.mxu1 %v1516_v52  ;;  %v999_v5 = vmax.f32 %v613_v55, 0.0  ;;  %v1001_v6 = vmax.f32 %v870_v56, 0.0 }
 0x161   : > { %v617_v59 = vadd.f32 %v616_v57, %v1755_v44  ;;  %v874_v60 = vadd.f32 %v873_v58, %v1757_v45  ;;  %v618_v61 = vpop.f32.mrb[63].mxu0  ;;  %v875_v62 = vpop.f32.mrb[63].mxu1  ;;  %1455 = vmatpush1.bf16.msra.mxu0 %v1454_v43  ;;  %1519 = vmatpush1.bf16.msra.mxu1 %v1518_v46 }
 0x162   : > { %v619_v63 = vadd.f32 %v618_v61, %v1759_v48  ;;  %v876_v0 = vadd.f32 %v875_v62, %v1761_v49  ;;  %v1006_v48 = vld [vmem:[%s1973_s3] sm:$0xff]  ;;  %v1009_v49 = vld [vmem:[%s1973_s3 + $0x18] sm:$0xff] }
 0x163   : > { %v1002_v3 = vmax.f32 %v617_v59, 0.0  ;;  %v1004_v4 = vmax.f32 %v874_v60, 0.0 }
 0x164   : > { %v1003_v7 = vmax.f32 %v619_v63, 0.0  ;;  %v1005_v8 = vmax.f32 %v876_v0, 0.0 }
 0x165   : > { %v1458_v9 = vpack.c.bf16 %v1002_v3, %v998_v1  ;;  %v1522_v44 = vpack.c.bf16 %v1004_v4, %v1000_v2 }
 0x166   : > { %v1456_v10 = vpack.c.bf16 %v1003_v7, %v999_v5  ;;  %v1520_v45 = vpack.c.bf16 %v1005_v8, %v1001_v6 }
 0x168   : > { %1457 = vmatprep.subr.bf16.mxu0 %v1456_v10  ;;  %1521 = vmatprep.subr.bf16.mxu1 %v1520_v45 }
 0x169   : > { %1459 = vmatpush1.bf16.msra.mxu0 %v1458_v9  ;;  %1523 = vmatpush1.bf16.msra.mxu1 %v1522_v44 }
 0x16c   : > { %1085 = vmatmul.mubr.f32.vlgmr.msra.gmra.mrb[64].mxu0 %v1006_v48  ;;  %1192 = vmatmul.mubr.f32.vlgmr.msra.gmra.mrb[64].mxu1 %v1006_v48 }
 0x16d   : > { %1090 = vmatprep.mubr.f32.mxu0 %v1009_v49  ;;  %1197 = vmatprep.mubr.f32.mxu1 %v1009_v49 }
 0x170   : > { %1091 = vmatmul.mubr.f32.gmra.mrb[66].mxu0 %v1008_v11  ;;  %1198 = vmatmul.mubr.f32.gmra.mrb[66].mxu1 %v1008_v11 }
 0x171   : > { %1096 = vmatprep.mubr.f32.mxu0 %v1011_v12  ;;  %1203 = vmatprep.mubr.f32.mxu1 %v1011_v12 }
 0x174   : > { %1097 = vmatmul.mubr.f32.gmra.mrb[68].mxu0 %v1010_v13  ;;  %1204 = vmatmul.mubr.f32.gmra.mrb[68].mxu1 %v1010_v13 }
 0x175   : > { %1102 = vmatprep.mubr.f32.mxu0 %v1013_v14  ;;  %1209 = vmatprep.mubr.f32.mxu1 %v1013_v14 }
 0x178   : > { %1103 = vmatmul.mubr.f32.gmra.mrb[70].mxu0 %v1012_v15  ;;  %1210 = vmatmul.mubr.f32.gmra.mrb[70].mxu1 %v1012_v15 }
 0x179   : > { %1108 = vmatprep.mubr.f32.mxu0 %v1015_v16  ;;  %1215 = vmatprep.mubr.f32.mxu1 %v1015_v16 }
 0x17c   : > { %1109 = vmatmul.mubr.f32.gmra.mrb[72].mxu0 %v1014_v17  ;;  %1216 = vmatmul.mubr.f32.gmra.mrb[72].mxu1 %v1014_v17 }
 0x17d   : > { %1114 = vmatprep.mubr.f32.mxu0 %v1017_v18  ;;  %1221 = vmatprep.mubr.f32.mxu1 %v1017_v18 }
 0x180   : > { %1115 = vmatmul.mubr.f32.gmra.mrb[74].mxu0 %v1016_v19  ;;  %1222 = vmatmul.mubr.f32.gmra.mrb[74].mxu1 %v1016_v19 }
 0x181   : > { %1120 = vmatprep.mubr.f32.mxu0 %v1019_v20  ;;  %1227 = vmatprep.mubr.f32.mxu1 %v1019_v20 }
 0x184   : > { %1121 = vmatmul.mubr.f32.gmra.mrb[76].mxu0 %v1018_v21  ;;  %1228 = vmatmul.mubr.f32.gmra.mrb[76].mxu1 %v1018_v21 }
 0x23f   : > { %v1086_v22 = vpop.f32.mrb[64].mxu0  ;;  %v1193_v23 = vpop.f32.mrb[64].mxu1 }
 0x240   : > { %1234 = vst [vmem:[%s1937_s8] sm:$0xff] %v1086_v22  ;;  %1236 = vst [vmem:[%s1937_s8 + $0x10] sm:$0xff] %v1193_v23  ;;  %v1088_v24 = vpop.f32.mrb[65].mxu0  ;;  %v1195_v25 = vpop.f32.mrb[65].mxu1 }
 0x241   : > { %1235 = vst [vmem:[%s1937_s8 + $0x8] sm:$0xff] %v1088_v24  ;;  %1237 = vst [vmem:[%s1937_s8 + $0x18] sm:$0xff] %v1195_v25 }
 0x243   : > { %v1092_v26 = vpop.f32.mrb[66].mxu0  ;;  %v1199_v27 = vpop.f32.mrb[66].mxu1 }
 0x244   : > { %1238 = vst [vmem:[%s1937_s8 + $0x20] sm:$0xff] %v1092_v26  ;;  %1240 = vst [vmem:[%s1937_s8 + $0x30] sm:$0xff] %v1199_v27  ;;  %v1094_v28 = vpop.f32.mrb[67].mxu0  ;;  %v1201_v29 = vpop.f32.mrb[67].mxu1 }
 0x245   : > { %1239 = vst [vmem:[%s1937_s8 + $0x28] sm:$0xff] %v1094_v28  ;;  %1241 = vst [vmem:[%s1937_s8 + $0x38] sm:$0xff] %v1201_v29 }
 0x247   : > { %v1098_v30 = vpop.f32.mrb[68].mxu0  ;;  %v1205_v31 = vpop.f32.mrb[68].mxu1 }
 0x248   : > { %1242 = vst [vmem:[%s1937_s8 + $0x40] sm:$0xff] %v1098_v30  ;;  %1244 = vst [vmem:[%s1937_s8 + $0x50] sm:$0xff] %v1205_v31  ;;  %v1100_v32 = vpop.f32.mrb[69].mxu0  ;;  %v1207_v33 = vpop.f32.mrb[69].mxu1 }
 0x249   : > { %1243 = vst [vmem:[%s1937_s8 + $0x48] sm:$0xff] %v1100_v32  ;;  %1245 = vst [vmem:[%s1937_s8 + $0x58] sm:$0xff] %v1207_v33 }
 0x24b   : > { %v1104_v34 = vpop.f32.mrb[70].mxu0  ;;  %v1211_v35 = vpop.f32.mrb[70].mxu1 }
 0x24c   : > { %1246 = vst [vmem:[%s1937_s8 + $0x60] sm:$0xff] %v1104_v34  ;;  %1248 = vst [vmem:[%s1937_s8 + $0x70] sm:$0xff] %v1211_v35  ;;  %v1106_v36 = vpop.f32.mrb[71].mxu0  ;;  %v1213_v37 = vpop.f32.mrb[71].mxu1 }
 0x24d   : > { %1247 = vst [vmem:[%s1937_s8 + $0x68] sm:$0xff] %v1106_v36  ;;  %1249 = vst [vmem:[%s1937_s8 + $0x78] sm:$0xff] %v1213_v37 }
 0x24f   : > { %v1110_v38 = vpop.f32.mrb[72].mxu0  ;;  %v1217_v39 = vpop.f32.mrb[72].mxu1 }
 0x250   : > { %1250 = vst [vmem:[%s1937_s8 + $0x80] sm:$0xff] %v1110_v38  ;;  %1252 = vst [vmem:[%s1937_s8 + $0x90] sm:$0xff] %v1217_v39  ;;  %v1112_v40 = vpop.f32.mrb[73].mxu0  ;;  %v1219_v41 = vpop.f32.mrb[73].mxu1 }
 0x251   : > { %1251 = vst [vmem:[%s1937_s8 + $0x88] sm:$0xff] %v1112_v40  ;;  %1253 = vst [vmem:[%s1937_s8 + $0x98] sm:$0xff] %v1219_v41 }
 0x253   : > { %v1116_v42 = vpop.f32.mrb[74].mxu0  ;;  %v1223_v43 = vpop.f32.mrb[74].mxu1 }
 0x254   : > { %1254 = vst [vmem:[%s1937_s8 + $0xa0] sm:$0xff] %v1116_v42  ;;  %1256 = vst [vmem:[%s1937_s8 + $0xb0] sm:$0xff] %v1223_v43  ;;  %v1118_v46 = vpop.f32.mrb[75].mxu0  ;;  %v1225_v47 = vpop.f32.mrb[75].mxu1 }
 0x255   : > { %1255 = vst [vmem:[%s1937_s8 + $0xa8] sm:$0xff] %v1118_v46  ;;  %1257 = vst [vmem:[%s1937_s8 + $0xb8] sm:$0xff] %v1225_v47 }
 0x257   : > { %v1122_v50 = vpop.f32.mrb[76].mxu0  ;;  %v1229_v51 = vpop.f32.mrb[76].mxu1 }
 0x258   : > { %1258 = vst [vmem:[%s1937_s8 + $0xc0] sm:$0x1] %v1122_v50  ;;  %1260 = vst [vmem:[%s1937_s8 + $0xd0] sm:$0x1] %v1229_v51  ;;  %v1124_v52 = vpop.f32.mrb[77].mxu0  ;;  %v1231_v53 = vpop.f32.mrb[77].mxu1 }
 0x259   : > { %1259 = vst [vmem:[%s1937_s8 + $0xc8] sm:$0x1] %v1124_v52  ;;  %1261 = vst [vmem:[%s1937_s8 + $0xd8] sm:$0x1] %v1231_v53 }
 0x25a PF: > { %s14_s15 = sadd.s32 1, %s1542_s15  }
 0x25b   : > { %p11_p4 = scmp.ge.s32.totalorder %s14_s15, 4  }
 0x25d   :  { %13 = sbr.rel (!%p11_p4) target bundleno = 1 (0x1), region = 66 }

</bundles_post_ra>
